<compile_context>
chip_gen: v7x
topology: tpu7x:2x2x1
jax: 0.10.0
libtpu: 0.0.40
codegen_flags: <defaults>
</compile_context>

<pallas_src>
import functools

import jax
import jax.numpy as jnp
from jax.experimental import pallas as pl
from jax.experimental.pallas import tpu as pltpu

BN_EPS = 1e-5

# Conservative on-chip budget for deciding whether the bf16 h-cache fits:
# leaves headroom below v7x's 64 MiB physical VMEM; trivially safe on
# v5e/v6e (128 MiB).
_VMEM_CACHE_BUDGET_BYTES = 48 * 1024 * 1024


def _round_up(x, m):
    return (x + m - 1) // m * m


def _modality_classifier_kernel(x_ref, w1_ref, b1_ref, gamma_ref, beta_ref,
                                w2_ref, b2_ref, out_ref,
                                sum_ref, sumsq_ref, scale_ref, shift_ref,
                                *maybe_h_cache,
                                true_b, tb, masked, use_cache):
    phase = pl.program_id(0)
    i = pl.program_id(1)
    nt = pl.num_programs(1)

    def compute_h():
        # x is already bf16 (cast fused into the wrapper's pad); f32 accumulate.
        h = jnp.dot(x_ref[...], w1_ref[...],
                    preferred_element_type=jnp.float32) + b1_ref[...]
        return jnp.maximum(h, 0.0)

    def accumulate_stats(h):
        @pl.when(i == 0)
        def _init():
            sum_ref[...] = jnp.zeros_like(sum_ref)
            sumsq_ref[...] = jnp.zeros_like(sumsq_ref)

        def _acc(hm):
            sum_ref[...] += jnp.sum(hm, axis=0, keepdims=True)
            sumsq_ref[...] += jnp.sum(hm * hm, axis=0, keepdims=True)

        if masked:
            # Only the last batch tile contains padded rows: gate the
            # iota+compare+select off the other tiles' critical path.
            @pl.when(i == nt - 1)
            def _masked_tile():
                row = i * tb + jax.lax.broadcasted_iota(jnp.int32, h.shape, 0)
                _acc(jnp.where(row < true_b, h, 0.0))

            @pl.when(i < nt - 1)
            def _full_tile():
                _acc(h)
        else:
            _acc(h)

        @pl.when(i == nt - 1)
        def _finalize():
            inv_b = jnp.float32(1.0 / true_b)
            mean = sum_ref[...] * inv_b
            var = jnp.maximum(sumsq_ref[...] * inv_b - mean * mean, 0.0)
            scale = gamma_ref[...] * jax.lax.rsqrt(var + BN_EPS)
            scale_ref[...] = scale
            shift_ref[...] = beta_ref[...] - mean * scale

    def project(h):
        h_bn = h * scale_ref[...] + shift_ref[...]          # folded BN FMA
        out = jnp.dot(h_bn.astype(jnp.bfloat16), w2_ref[...],
                      preferred_element_type=jnp.float32) + b2_ref[...]
        out_ref[...] = out.astype(out_ref.dtype)

    if use_cache:
        h_cache = maybe_h_cache[0]
        start = pl.multiple_of(i * tb, tb)

        @pl.when(phase == 0)
        def _phase0():
            h = compute_h()
            h_cache[pl.ds(start, tb), :] = h.astype(jnp.bfloat16)
            accumulate_stats(h)

        @pl.when(phase == 1)
        def _phase1():
            project(h_cache[pl.ds(start, tb), :].astype(jnp.float32))
    else:
        # Fallback: recompute fc1 in phase 1 (x is re-streamed from HBM).
        h = compute_h()

        @pl.when(phase == 0)
        def _phase0():
            accumulate_stats(h)

        @pl.when(phase == 1)
        def _phase1():
            project(h)


def prepare_params(params):
    """One-time padding + bf16 cast of the weights (do NOT re-do per forward)."""
    IN, H = params["w1"].shape
    C = params["w2"].shape[1]
    IN_p, H_p = _round_up(IN, 128), _round_up(H, 128)
    C_p = _round_up(max(C, 128), 128)               # lane-dense output slab
    f32, bf16 = jnp.float32, jnp.bfloat16
    return {
        "w1": jnp.pad(params["w1"].astype(bf16), ((0, IN_p - IN), (0, H_p - H))),
        "b1": jnp.pad(params["b1"].astype(f32), ((0, 0), (0, H_p - H))),
        "gamma": jnp.pad(params["gamma"].astype(f32), ((0, 0), (0, H_p - H))),
        "beta": jnp.pad(params["beta"].astype(f32), ((0, 0), (0, H_p - H))),
        "w2": jnp.pad(params["w2"].astype(bf16), ((0, H_p - H), (0, C_p - C))),
        "b2": jnp.pad(params["b2"].astype(f32), ((0, 0), (0, C_p - C))),
        "dims": (IN, H, C),
    }


def modality_classifier_forward(x, prepared, *, batch_tile=512):
    """x: (B, ...) float array (flattened like x.view(B, -1)).
    prepared: output of prepare_params()."""
    IN, H, C = prepared["dims"]
    B = x.shape[0]
    x2 = x.reshape(B, -1)
    assert x2.shape[1] == IN, f"flattened input {x2.shape[1]} != input_size {IN}"

    IN_p, H_p = prepared["w1"].shape
    C_p = prepared["w2"].shape[1]

    # Batch tile: multiple of 16 (bf16 sublane packing); collapse to one grid
    # step when the whole batch fits a single tile.
    tb = min(_round_up(batch_tile, 16), _round_up(B, 16))
    B_p = _round_up(B, tb)
    nt = B_p // tb

    # Pre-cast x to bf16 fused into the (already copy-making) pad.
    xp = jnp.pad(x2.astype(jnp.bfloat16), ((0, B_p - B), (0, IN_p - IN)))

    # --- VMEM accounting: decide whether the bf16 h-cache fits ---------------
    bf16_b, f32_b = 2, 4
    w_bytes = (IN_p * H_p + H_p * C_p) * bf16_b * 2      # weights, double-buffered
    vec_bytes = (3 * H_p + C_p) * f32_b * 2              # b1/gamma/beta/b2 inputs
    scratch_vec_bytes = 4 * H_p * f32_b                  # sum/sumsq/scale/shift
    x_stream_bytes = 2 * tb * IN_p * bf16_b              # double-buffered x tile
    out_stream_bytes = 2 * tb * C_p * f32_b              # double-buffered out tile
    base_bytes = (w_bytes + vec_bytes + scratch_vec_bytes
                  + x_stream_bytes + out_stream_bytes)
    cache_bytes = B_p * H_p * bf16_b
    use_cache = (base_bytes + cache_bytes) <= _VMEM_CACHE_BUDGET_BYTES

    total_bytes = base_bytes + (cache_bytes if use_cache else 0)
    vmem_limit = int(min(max(total_bytes * 5 // 4 + (4 << 20), 32 << 20),
                         64 << 20))                      # cap at v7x physical

    kernel = functools.partial(_modality_classifier_kernel,
                               true_b=B, tb=tb, masked=(B_p != B),
                               use_cache=use_cache)

    const = lambda p, i: (0, 0)                          # resident weights/vectors
    if use_cache:
        # Stream x only during phase 0; hold block 0 during phase 1.
        x_map = lambda p, i: (i * (1 - p), 0)
    else:
        x_map = lambda p, i: (i, 0)                      # recompute path

    scratch = [pltpu.VMEM((1, H_p), jnp.float32) for _ in range(4)]
    if use_cache:
        scratch.append(pltpu.VMEM((B_p, H_p), jnp.bfloat16))

    out = pl.pallas_call(
        kernel,
        out_shape=jax.ShapeDtypeStruct((B_p, C_p), jnp.float32),
        grid_spec=pltpu.PrefetchScalarGridSpec(
            num_scalar_prefetch=0,
            grid=(2, nt),                                # (phase, batch tile)
            in_specs=[
                pl.BlockSpec((tb, IN_p), x_map),         # x tile (bf16)
                pl.BlockSpec((IN_p, H_p), const),        # w1 (bf16)
                pl.BlockSpec((1, H_p), const),           # b1
                pl.BlockSpec((1, H_p), const),           # gamma
                pl.BlockSpec((1, H_p), const),           # beta
                pl.BlockSpec((H_p, C_p), const),         # w2 (bf16)
                pl.BlockSpec((1, C_p), const),           # b2
            ],
            # Output block 0 is held (never written) throughout phase 0; each
            # block is then written exactly once, consecutively, in phase 1.
            # Relies on Pallas only flushing an output block on block-index
            # change -- do not add phase-0 writes or change RevisitMode.
            out_specs=pl.BlockSpec((tb, C_p), lambda p, i: (i * p, 0)),
            scratch_shapes=scratch,
        ),
        compiler_params=pltpu.CompilerParams(
            # Both grid axes carry cross-step state (stats reduction, phase
            # ordering, resident cache), so they must stay "arbitrary".
            dimension_semantics=("arbitrary", "arbitrary"),
            vmem_limit_bytes=vmem_limit),
    )(xp, prepared["w1"], prepared["b1"], prepared["gamma"],
      prepared["beta"], prepared["w2"], prepared["b2"])
    return out[:B, :C]


def init_params(key, input_size, hidden_size, num_classes):
    """Deterministic init mimicking PyTorch defaults (uniform +-1/sqrt(fan_in)).
    Linear weights stored pre-transposed: (in_features, out_features)."""
    k1, k2, k3, k4 = jax.random.split(key, 4)
    bound1 = 1.0 / (input_size ** 0.5)
    bound2 = 1.0 / (hidden_size ** 0.5)
    w1 = jax.random.uniform(k1, (input_size, hidden_size), jnp.float32,
                            minval=-bound1, maxval=bound1)
    b1 = jax.random.uniform(k2, (1, hidden_size), jnp.float32,
                            minval=-bound1, maxval=bound1)
    w2 = jax.random.uniform(k3, (hidden_size, num_classes), jnp.float32,
                            minval=-bound2, maxval=bound2)
    b2 = jax.random.uniform(k4, (1, num_classes), jnp.float32,
                            minval=-bound2, maxval=bound2)
    gamma = jnp.ones((1, hidden_size), jnp.float32)   # BatchNorm1d weight
    beta = jnp.zeros((1, hidden_size), jnp.float32)   # BatchNorm1d bias
    return {"w1": w1, "b1": b1, "gamma": gamma, "beta": beta, "w2": w2, "b2": b2}


def _reference_forward(x, p):
    # Pure-JAX mirror of the kernel arithmetic (bf16 MXU operands, f32
    # accumulation, training-mode batch statistics).
    h = jnp.dot(x.astype(jnp.bfloat16), p["w1"].astype(jnp.bfloat16),
                preferred_element_type=jnp.float32) + p["b1"]
    h = jnp.maximum(h, 0.0)
    mean = jnp.mean(h, axis=0, keepdims=True)
    var = jnp.maximum(jnp.mean(h * h, axis=0, keepdims=True) - mean * mean, 0.0)
    scale = p["gamma"] * jax.lax.rsqrt(var + BN_EPS)
    shift = p["beta"] - mean * scale
    h_bn = h * scale + shift
    return jnp.dot(h_bn.astype(jnp.bfloat16), p["w2"].astype(jnp.bfloat16),
                   preferred_element_type=jnp.float32) + p["b2"]


if __name__ == "__main__":
    # Small shapes consistent with the module: flatten -> fc1 -> bn -> fc2.
    B, INPUT_SIZE, HIDDEN, NUM_CLASSES = 24, 256, 128, 2

    key = jax.random.PRNGKey(0)
    kx, kp = jax.random.split(key)
    # Raw input e.g. (B, 4, 8, 8) features; forward flattens it (x.view(B, -1)).
    x_raw = jax.random.normal(kx, (B, 4, 8, 8), jnp.float32)

    params = init_params(kp, INPUT_SIZE, HIDDEN, NUM_CLASSES)
    prepared = prepare_params(params)          # one-time pad + bf16 cast

    # Default config: tb=32 (multiple of 16), nt=1 -> whole grid is 2 steps.
    out = jax.block_until_ready(modality_classifier_forward(x_raw, prepared))

    # Small tile exercises multi-tile stats accumulation + last-tile masking.
    out_tiled = jax.block_until_ready(
        modality_classifier_forward(x_raw, prepared, batch_tile=16))

    ref = _reference_forward(x_raw.reshape(B, -1), params)
    assert out.shape == (B, NUM_CLASSES)
    assert out_tiled.shape == (B, NUM_CLASSES)
    # 2e-2 tolerance: the kernel additionally rounds h through bf16 for the
    # VMEM h-cache, which the f32-h reference does not mirror.
    assert jnp.allclose(out, ref, atol=2e-2, rtol=2e-2), "mismatch (single tile)"
    assert jnp.allclose(out_tiled, ref, atol=2e-2, rtol=2e-2), "mismatch (tiled)"
    print("KERNEL_OK")
</pallas_src>

<mosaic_0001>
module attributes {stable_mosaic.version = 11 : i64} {
  func.func @_modality_classifier_kernel(%arg0: i32, %arg1: i32, %arg2: memref<32x256xbf16, #tpu.memory_space<vmem>>, %arg3: memref<256x128xbf16, #tpu.memory_space<vmem>>, %arg4: memref<1x128xf32, #tpu.memory_space<vmem>>, %arg5: memref<1x128xf32, #tpu.memory_space<vmem>>, %arg6: memref<1x128xf32, #tpu.memory_space<vmem>>, %arg7: memref<128x128xbf16, #tpu.memory_space<vmem>>, %arg8: memref<1x128xf32, #tpu.memory_space<vmem>>, %arg9: memref<32x128xf32, #tpu.memory_space<vmem>>, %arg10: memref<1x128xf32, #tpu.memory_space<vmem>>, %arg11: memref<1x128xf32, #tpu.memory_space<vmem>>, %arg12: memref<1x128xf32, #tpu.memory_space<vmem>>, %arg13: memref<1x128xf32, #tpu.memory_space<vmem>>, %arg14: memref<32x128xbf16, #tpu.memory_space<vmem>>) attributes {dimension_semantics = [#tpu.dimension_semantics<arbitrary>, #tpu.dimension_semantics<arbitrary>], iteration_bounds = array<i64: 2, 1>, scalar_prefetch = 0 : i64, scratch_operands = 5 : i64, tpu.core_type = #tpu.core_type<tc>, window_params = [{transform_indices = @transform_0, window_bounds = array<i64: 32, 256>}, {pipeline_mode = #tpu.pipeline_mode<synchronous>, transform_indices = @transform_1, window_bounds = array<i64: 256, 128>}, {pipeline_mode = #tpu.pipeline_mode<synchronous>, transform_indices = @transform_2, window_bounds = array<i64: 1, 128>}, {pipeline_mode = #tpu.pipeline_mode<synchronous>, transform_indices = @transform_3, window_bounds = array<i64: 1, 128>}, {pipeline_mode = #tpu.pipeline_mode<synchronous>, transform_indices = @transform_4, window_bounds = array<i64: 1, 128>}, {pipeline_mode = #tpu.pipeline_mode<synchronous>, transform_indices = @transform_5, window_bounds = array<i64: 128, 128>}, {pipeline_mode = #tpu.pipeline_mode<synchronous>, transform_indices = @transform_6, window_bounds = array<i64: 1, 128>}, {transform_indices = @transform_7, window_bounds = array<i64: 32, 128>}]} {
    %c32_i32 = arith.constant 32 : i32
    %0 = arith.muli %arg1, %c32_i32 : i32
    %1 = tpu.assume_multiple %0, 32 : i32
    %c0_i32 = arith.constant 0 : i32
    %2 = arith.cmpi eq, %arg0, %c0_i32 : i32
    %3 = arith.extui %2 : i1 to i32
    %c0_i32_0 = arith.constant 0 : i32
    %4 = arith.cmpi ne, %3, %c0_i32_0 : i32
    scf.if %4 {
      %c0 = arith.constant 0 : index
      %c0_2 = arith.constant 0 : index
      %8 = vector.load %arg2[%c0, %c0_2] : memref<32x256xbf16, #tpu.memory_space<vmem>>, vector<32x256xbf16>
      %c0_3 = arith.constant 0 : index
      %c0_4 = arith.constant 0 : index
      %9 = vector.load %arg3[%c0_3, %c0_4] : memref<256x128xbf16, #tpu.memory_space<vmem>>, vector<256x128xbf16>
      %cst = arith.constant dense<0.000000e+00> : vector<32x128xf32>
      %10 = tpu.matmul %8, %9, %cst {dimension_numbers = #tpu.dot_dimension_numbers<[1], [0], [0], [1], [0, 0, 1, 1], [], []>} : vector<32x256xbf16>, vector<256x128xbf16>, vector<32x128xf32> -> vector<32x128xf32>
      %c0_5 = arith.constant 0 : index
      %c0_6 = arith.constant 0 : index
      %11 = vector.load %arg4[%c0_5, %c0_6] : memref<1x128xf32, #tpu.memory_space<vmem>>, vector<1x128xf32>
      %12 = vector.broadcast %11 : vector<1x128xf32> to vector<32x128xf32>
      %13 = arith.addf %10, %12 : vector<32x128xf32>
      %cst_7 = arith.constant 0.000000e+00 : f32
      %14 = vector.broadcast %cst_7 : f32 to vector<32x128xf32>
      %15 = arith.maximumf %13, %14 : vector<32x128xf32>
      %16 = arith.truncf %15 : vector<32x128xf32> to vector<32x128xbf16>
      %17 = arith.index_cast %1 : i32 to index
      %c0_8 = arith.constant 0 : index
      %18 = vector.load %arg14[%17, %c0_8] : memref<32x128xbf16, #tpu.memory_space<vmem>>, vector<32x128xbf16>
      tpu.vector_store %arg14[%17, %c0_8], %16 {strides = array<i32>} : memref<32x128xbf16, #tpu.memory_space<vmem>>, vector<32x128xbf16>,
      %c0_i32_9 = arith.constant 0 : i32
      %19 = arith.cmpi eq, %arg1, %c0_i32_9 : i32
      %20 = arith.extui %19 : i1 to i32
      %c0_i32_10 = arith.constant 0 : i32
      %21 = arith.cmpi ne, %20, %c0_i32_10 : i32
      scf.if %21 {
        %cst_17 = arith.constant 0.000000e+00 : f32
        %31 = vector.broadcast %cst_17 : f32 to vector<1x128xf32>
        %c0_18 = arith.constant 0 : index
        %c0_19 = arith.constant 0 : index
        %32 = vector.load %arg10[%c0_18, %c0_19] : memref<1x128xf32, #tpu.memory_space<vmem>>, vector<1x128xf32>
        tpu.vector_store %arg10[%c0_18, %c0_19], %31 {strides = array<i32>} : memref<1x128xf32, #tpu.memory_space<vmem>>, vector<1x128xf32>,
        %cst_20 = arith.constant 0.000000e+00 : f32
        %33 = vector.broadcast %cst_20 : f32 to vector<1x128xf32>
        %c0_21 = arith.constant 0 : index
        %c0_22 = arith.constant 0 : index
        %34 = vector.load %arg11[%c0_21, %c0_22] : memref<1x128xf32, #tpu.memory_space<vmem>>, vector<1x128xf32>
        tpu.vector_store %arg11[%c0_21, %c0_22], %33 {strides = array<i32>} : memref<1x128xf32, #tpu.memory_space<vmem>>, vector<1x128xf32>,
      } else {
      }
      %c0_i32_11 = arith.constant 0 : i32
      %22 = arith.cmpi eq, %arg1, %c0_i32_11 : i32
      %23 = arith.extui %22 : i1 to i32
      %c0_i32_12 = arith.constant 0 : i32
      %24 = arith.cmpi ne, %23, %c0_i32_12 : i32
      scf.if %24 {
        %c32_i32_17 = arith.constant 32 : i32
        %31 = arith.muli %arg1, %c32_i32_17 : i32
        %32 = tpu.iota {dimensions = array<i32: 0>} : vector<32x128xi32>
        %33 = vector.broadcast %31 : i32 to vector<32x128xi32>
        %34 = arith.addi %33, %32 : vector<32x128xi32>
        %c24_i32 = arith.constant 24 : i32
        %35 = vector.broadcast %c24_i32 : i32 to vector<32x128xi32>
        %36 = arith.cmpi slt, %34, %35 : vector<32x128xi32>
        %cst_18 = arith.constant 0.000000e+00 : f32
        %37 = vector.broadcast %cst_18 : f32 to vector<32x128xf32>
        %38 = arith.select %36, %15, %37 : vector<32x128xi1>, vector<32x128xf32>
        %c0_19 = arith.constant 0 : index
        %c0_20 = arith.constant 0 : index
        %39 = vector.load %arg10[%c0_19, %c0_20] : memref<1x128xf32, #tpu.memory_space<vmem>>, vector<1x128xf32>
        %cst_21 = arith.constant dense<0.000000e+00> : vector<128xf32>
        %40 = vector.multi_reduction <add>, %38, %cst_21 [0] : vector<32x128xf32> to vector<128xf32>
        %41 = vector.shape_cast %40 : vector<128xf32> to vector<1x128xf32>
        %42 = arith.addf %39, %41 : vector<1x128xf32>
        %c0_22 = arith.constant 0 : index
        %c0_23 = arith.constant 0 : index
        %43 = vector.load %arg10[%c0_22, %c0_23] : memref<1x128xf32, #tpu.memory_space<vmem>>, vector<1x128xf32>
        tpu.vector_store %arg10[%c0_22, %c0_23], %42 {strides = array<i32>} : memref<1x128xf32, #tpu.memory_space<vmem>>, vector<1x128xf32>,
        %c0_24 = arith.constant 0 : index
        %c0_25 = arith.constant 0 : index
        %44 = vector.load %arg11[%c0_24, %c0_25] : memref<1x128xf32, #tpu.memory_space<vmem>>, vector<1x128xf32>
        %45 = arith.mulf %38, %38 : vector<32x128xf32>
        %cst_26 = arith.constant dense<0.000000e+00> : vector<128xf32>
        %46 = vector.multi_reduction <add>, %45, %cst_26 [0] : vector<32x128xf32> to vector<128xf32>
        %47 = vector.shape_cast %46 : vector<128xf32> to vector<1x128xf32>
        %48 = arith.addf %44, %47 : vector<1x128xf32>
        %c0_27 = arith.constant 0 : index
        %c0_28 = arith.constant 0 : index
        %49 = vector.load %arg11[%c0_27, %c0_28] : memref<1x128xf32, #tpu.memory_space<vmem>>, vector<1x128xf32>
        tpu.vector_store %arg11[%c0_27, %c0_28], %48 {strides = array<i32>} : memref<1x128xf32, #tpu.memory_space<vmem>>, vector<1x128xf32>,
      } else {
      }
      %c0_i32_13 = arith.constant 0 : i32
      %25 = arith.cmpi slt, %arg1, %c0_i32_13 : i32
      %26 = arith.extui %25 : i1 to i32
      %c0_i32_14 = arith.constant 0 : i32
      %27 = arith.cmpi ne, %26, %c0_i32_14 : i32
      scf.if %27 {
        %c0_17 = arith.constant 0 : index
        %c0_18 = arith.constant 0 : index
        %31 = vector.load %arg10[%c0_17, %c0_18] : memref<1x128xf32, #tpu.memory_space<vmem>>, vector<1x128xf32>
        %cst_19 = arith.constant dense<0.000000e+00> : vector<128xf32>
        %32 = vector.multi_reduction <add>, %15, %cst_19 [0] : vector<32x128xf32> to vector<128xf32>
        %33 = vector.shape_cast %32 : vector<128xf32> to vector<1x128xf32>
        %34 = arith.addf %31, %33 : vector<1x128xf32>
        %c0_20 = arith.constant 0 : index
        %c0_21 = arith.constant 0 : index
        %35 = vector.load %arg10[%c0_20, %c0_21] : memref<1x128xf32, #tpu.memory_space<vmem>>, vector<1x128xf32>
        tpu.vector_store %arg10[%c0_20, %c0_21], %34 {strides = array<i32>} : memref<1x128xf32, #tpu.memory_space<vmem>>, vector<1x128xf32>,
        %c0_22 = arith.constant 0 : index
        %c0_23 = arith.constant 0 : index
        %36 = vector.load %arg11[%c0_22, %c0_23] : memref<1x128xf32, #tpu.memory_space<vmem>>, vector<1x128xf32>
        %37 = arith.mulf %15, %15 : vector<32x128xf32>
        %cst_24 = arith.constant dense<0.000000e+00> : vector<128xf32>
        %38 = vector.multi_reduction <add>, %37, %cst_24 [0] : vector<32x128xf32> to vector<128xf32>
        %39 = vector.shape_cast %38 : vector<128xf32> to vector<1x128xf32>
        %40 = arith.addf %36, %39 : vector<1x128xf32>
        %c0_25 = arith.constant 0 : index
        %c0_26 = arith.constant 0 : index
        %41 = vector.load %arg11[%c0_25, %c0_26] : memref<1x128xf32, #tpu.memory_space<vmem>>, vector<1x128xf32>
        tpu.vector_store %arg11[%c0_25, %c0_26], %40 {strides = array<i32>} : memref<1x128xf32, #tpu.memory_space<vmem>>, vector<1x128xf32>,
      } else {
      }
      %c0_i32_15 = arith.constant 0 : i32
      %28 = arith.cmpi eq, %arg1, %c0_i32_15 : i32
      %29 = arith.extui %28 : i1 to i32
      %c0_i32_16 = arith.constant 0 : i32
      %30 = arith.cmpi ne, %29, %c0_i32_16 : i32
      scf.if %30 {
        %c0_17 = arith.constant 0 : index
        %c0_18 = arith.constant 0 : index
        %31 = vector.load %arg10[%c0_17, %c0_18] : memref<1x128xf32, #tpu.memory_space<vmem>>, vector<1x128xf32>
        %cst_19 = arith.constant 0.0416666679 : f32
        %32 = vector.broadcast %cst_19 : f32 to vector<1x128xf32>
        %33 = arith.mulf %31, %32 : vector<1x128xf32>
        %c0_20 = arith.constant 0 : index
        %c0_21 = arith.constant 0 : index
        %34 = vector.load %arg11[%c0_20, %c0_21] : memref<1x128xf32, #tpu.memory_space<vmem>>, vector<1x128xf32>
        %cst_22 = arith.constant 0.0416666679 : f32
        %35 = vector.broadcast %cst_22 : f32 to vector<1x128xf32>
        %36 = arith.mulf %34, %35 : vector<1x128xf32>
        %37 = arith.mulf %33, %33 : vector<1x128xf32>
        %38 = arith.subf %36, %37 : vector<1x128xf32>
        %cst_23 = arith.constant 0.000000e+00 : f32
        %39 = vector.broadcast %cst_23 : f32 to vector<1x128xf32>
        %40 = arith.maximumf %38, %39 : vector<1x128xf32>
        %c0_24 = arith.constant 0 : index
        %c0_25 = arith.constant 0 : index
        %41 = vector.load %arg5[%c0_24, %c0_25] : memref<1x128xf32, #tpu.memory_space<vmem>>, vector<1x128xf32>
        %cst_26 = arith.constant 9.99999974E-6 : f32
        %42 = vector.broadcast %cst_26 : f32 to vector<1x128xf32>
        %43 = arith.addf %40, %42 : vector<1x128xf32>
        %44 = math.rsqrt %43 : vector<1x128xf32>
        %45 = arith.mulf %41, %44 : vector<1x128xf32>
        %c0_27 = arith.constant 0 : index
        %c0_28 = arith.constant 0 : index
        %46 = vector.load %arg12[%c0_27, %c0_28] : memref<1x128xf32, #tpu.memory_space<vmem>>, vector<1x128xf32>
        tpu.vector_store %arg12[%c0_27, %c0_28], %45 {strides = array<i32>} : memref<1x128xf32, #tpu.memory_space<vmem>>, vector<1x128xf32>,
        %c0_29 = arith.constant 0 : index
        %c0_30 = arith.constant 0 : index
        %47 = vector.load %arg6[%c0_29, %c0_30] : memref<1x128xf32, #tpu.memory_space<vmem>>, vector<1x128xf32>
        %48 = arith.mulf %33, %45 : vector<1x128xf32>
        %49 = arith.subf %47, %48 : vector<1x128xf32>
        %c0_31 = arith.constant 0 : index
        %c0_32 = arith.constant 0 : index
        %50 = vector.load %arg13[%c0_31, %c0_32] : memref<1x128xf32, #tpu.memory_space<vmem>>, vector<1x128xf32>
        tpu.vector_store %arg13[%c0_31, %c0_32], %49 {strides = array<i32>} : memref<1x128xf32, #tpu.memory_space<vmem>>, vector<1x128xf32>,
      } else {
      }
    } else {
    }
    %c1_i32 = arith.constant 1 : i32
    %5 = arith.cmpi eq, %arg0, %c1_i32 : i32
    %6 = arith.extui %5 : i1 to i32
    %c0_i32_1 = arith.constant 0 : i32
    %7 = arith.cmpi ne, %6, %c0_i32_1 : i32
    scf.if %7 {
      %8 = arith.index_cast %1 : i32 to index
      %c0 = arith.constant 0 : index
      %9 = vector.load %arg14[%8, %c0] : memref<32x128xbf16, #tpu.memory_space<vmem>>, vector<32x128xbf16>
      %10 = arith.extf %9 : vector<32x128xbf16> to vector<32x128xf32>
      %c0_2 = arith.constant 0 : index
      %c0_3 = arith.constant 0 : index
      %11 = vector.load %arg12[%c0_2, %c0_3] : memref<1x128xf32, #tpu.memory_space<vmem>>, vector<1x128xf32>
      %12 = vector.broadcast %11 : vector<1x128xf32> to vector<32x128xf32>
      %13 = arith.mulf %10, %12 : vector<32x128xf32>
      %c0_4 = arith.constant 0 : index
      %c0_5 = arith.constant 0 : index
      %14 = vector.load %arg13[%c0_4, %c0_5] : memref<1x128xf32, #tpu.memory_space<vmem>>, vector<1x128xf32>
      %15 = vector.broadcast %14 : vector<1x128xf32> to vector<32x128xf32>
      %16 = arith.addf %13, %15 : vector<32x128xf32>
      %17 = arith.truncf %16 : vector<32x128xf32> to vector<32x128xbf16>
      %c0_6 = arith.constant 0 : index
      %c0_7 = arith.constant 0 : index
      %18 = vector.load %arg7[%c0_6, %c0_7] : memref<128x128xbf16, #tpu.memory_space<vmem>>, vector<128x128xbf16>
      %cst = arith.constant dense<0.000000e+00> : vector<32x128xf32>
      %19 = tpu.matmul %17, %18, %cst {dimension_numbers = #tpu.dot_dimension_numbers<[1], [0], [0], [1], [0, 0, 1, 1], [], []>} : vector<32x128xbf16>, vector<128x128xbf16>, vector<32x128xf32> -> vector<32x128xf32>
      %c0_8 = arith.constant 0 : index
      %c0_9 = arith.constant 0 : index
      %20 = vector.load %arg8[%c0_8, %c0_9] : memref<1x128xf32, #tpu.memory_space<vmem>>, vector<1x128xf32>
      %21 = vector.broadcast %20 : vector<1x128xf32> to vector<32x128xf32>
      %22 = arith.addf %19, %21 : vector<32x128xf32>
      %c0_10 = arith.constant 0 : index
      %c0_11 = arith.constant 0 : index
      %23 = vector.load %arg9[%c0_10, %c0_11] : memref<32x128xf32, #tpu.memory_space<vmem>>, vector<32x128xf32>
      tpu.vector_store %arg9[%c0_10, %c0_11], %22 {strides = array<i32>} : memref<32x128xf32, #tpu.memory_space<vmem>>, vector<32x128xf32>,
    } else {
    }
    return
  }
  func.func @transform_0(%arg0: i32, %arg1: i32) -> (i32, i32) {
    %c1_i32 = arith.constant 1 : i32
    %0 = arith.subi %c1_i32, %arg0 : i32
    %1 = arith.muli %arg1, %0 : i32
    %c0_i32 = arith.constant 0 : i32
    %c0_i32_0 = arith.constant 0 : i32
    return %1, %c0_i32 : i32, i32
  }
  func.func @transform_1(%arg0: i32, %arg1: i32) -> (i32, i32) {
    %c0_i32 = arith.constant 0 : i32
    %c0_i32_0 = arith.constant 0 : i32
    %c0_i32_1 = arith.constant 0 : i32
    return %c0_i32, %c0_i32_0 : i32, i32
  }
  func.func @transform_2(%arg0: i32, %arg1: i32) -> (i32, i32) {
    %c0_i32 = arith.constant 0 : i32
    %c0_i32_0 = arith.constant 0 : i32
    %c0_i32_1 = arith.constant 0 : i32
    return %c0_i32, %c0_i32_0 : i32, i32
  }
  func.func @transform_3(%arg0: i32, %arg1: i32) -> (i32, i32) {
    %c0_i32 = arith.constant 0 : i32
    %c0_i32_0 = arith.constant 0 : i32
    %c0_i32_1 = arith.constant 0 : i32
    return %c0_i32, %c0_i32_0 : i32, i32
  }
  func.func @transform_4(%arg0: i32, %arg1: i32) -> (i32, i32) {
    %c0_i32 = arith.constant 0 : i32
    %c0_i32_0 = arith.constant 0 : i32
    %c0_i32_1 = arith.constant 0 : i32
    return %c0_i32, %c0_i32_0 : i32, i32
  }
  func.func @transform_5(%arg0: i32, %arg1: i32) -> (i32, i32) {
    %c0_i32 = arith.constant 0 : i32
    %c0_i32_0 = arith.constant 0 : i32
    %c0_i32_1 = arith.constant 0 : i32
    return %c0_i32, %c0_i32_0 : i32, i32
  }
  func.func @transform_6(%arg0: i32, %arg1: i32) -> (i32, i32) {
    %c0_i32 = arith.constant 0 : i32
    %c0_i32_0 = arith.constant 0 : i32
    %c0_i32_1 = arith.constant 0 : i32
    return %c0_i32, %c0_i32_0 : i32, i32
  }
  func.func @transform_7(%arg0: i32, %arg1: i32) -> (i32, i32) {
    %0 = arith.muli %arg1, %arg0 : i32
    %c0_i32 = arith.constant 0 : i32
    %c0_i32_0 = arith.constant 0 : i32
    return %0, %c0_i32 : i32, i32
  }
}

</mosaic_0001>

<bundles_post_ra>
// kernel: tpu_custom_call.1
= control target key start
LH: loop header
LB: loop body
LE: loop exit
PB: predicated region body
PF: predicated region fallthrough
CT: control target
= control target key end

     0   :  { %12 = vsyncpa [#allocation8], 0  ;;  %s1560_s0 = inlined_call_operand.hbm [shape: bf16[32,256], index: 0, kind: input, shape index: {}]   ;;  %s1561_s1 = inlined_call_operand.hbm [shape: bf16[256,128], index: 1, kind: input, shape index: {}]   ;;  %s1562_s2 = inlined_call_operand.vmem [shape: f32[1,128], index: 2, kind: input, shape index: {}]   ;;  %s1563_s3 = inlined_call_operand.vmem [shape: f32[1,128], index: 3, kind: input, shape index: {}]   ;;  %s1564_s4 = inlined_call_operand.vmem [shape: f32[1,128], index: 4, kind: input, shape index: {}]   ;;  %s1565_s5 = inlined_call_operand.hbm [shape: bf16[128,128], index: 5, kind: input, shape index: {}]   ;;  %s1566_s6 = inlined_call_operand.vmem [shape: f32[1,128], index: 6, kind: input, shape index: {}]   ;;  %s1567_s7 = inlined_call_operand.hbm [shape: f32[32,128], index: 7, kind: output, shape index: {}]  }
   0x1   :  { %14 = vsyncpa [#allocation8 + $0x1], 0 }
   0x2   :  { %15 = vsyncpa [#allocation11], 0 }
   0x3   :  { %16 = vsyncpa [#allocation9], 0 }
   0x4   :  { %18 = vsyncpa [#allocation9 + $0x1], 0  ;;  %s1390_s24 = smov 0   ;;  %s1392_s25 = smov 0  }
   0x5   :  { %s1394_s26 = smov 0  }
   0x6 LB: > { %s962_s27 = sadd.s32 4294967295, %s1337_s26   ;;  %s963_s28 = sadd.s32 4294967294, %s1337_s26   ;;  %s1337_s26 = sphi %s1394_s26, %s24_s26   ;;  %s1333_s25 = sphi %s1392_s25, %s1582_s25   ;;  %s1329_s24 = sphi %s1390_s24, %s1581_s24  }
   0x7   : > { %s36_s29 = sadd.s32 1, %s1333_s25  ;;  %p964_p0 = scmp.ge.s32.totalorder %s1337_s26, 1 }
   0x8   : > { %p38_p1 = scmp.ge.s32.totalorder %s36_s29, 2  ;;  %p225_p2 = scmp.lt.s32.totalorder %s1337_s26, 3 }
   0x9   : > { %p1412_p3 = scmp.eq.s32.totalorder %s962_s27, 0  ;;  %s1339_s9 = smov [#allocation10]  }
   0xa   : > { %s1584_s29 = smov (%p38_p1, %s36_s29), 0  ;;  %p1418_p4 = pnand %p964_p0, %p225_p2 }
   0xb   : > { %s1571_s30 = scalar_select %p1412_p3, 1, 0 }
   0xc   : > { %s1572_s8 = scalar_select %p1418_p4, 1, 0 }
   0xd   : > { %s237_s10 = sshll.u32 %s1339_s9, 4  ;;  %p1101_p5 = pneg %p1418_p4  ;;  %s238_s10 = int_to_ptr.vmem [resolvable:$true] %s237_s10 }
   0xe   : > { %s1340_s12 = smov [#allocation12]   ;;  %s1193_s16 = scalar_lea.hbm %s1561_s1, 2048 }
   0xf   : > { %p1427_p7 = pnand %p1412_p3, %p1101_p5  ;;  %s259_s13 = sshll.u32 %s1340_s12, 4  ;;  %s260_s13 = int_to_ptr.vmem [resolvable:$true] %s259_s13 }
  0x10   : > { %p1194_p9 = scmp.ne.s32.totalorder %s1561_s1, %s1193_s16  ;;  %p1200_p13 = scmp.lt.u32.totalorder %s1193_s16, %s1561_s1 }
  0x11   : > { %p1195_p10 = pneg %p1427_p7 }
  0x13   : > { %p1196_p11 = pnand %p1195_p10, %p1194_p9 }
  0x15   : > { %p1197_p12 = pneg %p1196_p11 }
  0x17   : > { %p1202_p0 = pnand %p1200_p13, %p1197_p12 }
  0x19   : > { %1205 = shalt.err (!%p1202_p0)
}
  0x1a   : > { %s1206_s21 = scalar_lea.vmem %s238_s10, 2048  ;;  %p1214_p6 = scmp.lt.s32.totalorder %s238_s10, %s238_s10 }
  0x1b   : > { %p1207_p1 = scmp.ne.s32.totalorder %s238_s10, %s1206_s21  ;;  %p1215_p8 = scmp.lt.s32.totalorder %s1206_s21, %s1206_s21 }
  0x1d   : > { %p1209_p2 = pnand %p1207_p1, %p1195_p10  ;;  %p1216_p3 = por %p1215_p8, %p1214_p6 }
  0x1f   : > { %p1210_p5 = pneg %p1209_p2 }
  0x21   : > { %p1217_p4 = pnand %p1216_p3, %p1210_p5 }
  0x23   : > { %1220 = shalt.err (!%p1217_p4)
}
  0x24   : > { %s1341_s22 = smov 64   ;;  %s1342_s23 = smov 4  }
  0x25   : > { %1104 = dma.hbm_to_vmem [thread:$0]  (!%p1427_p7), %s1561_s1, 2048, %s238_s10, [#allocation11], %s1341_s22, %s1341_s22, %s1342_s23  }
  0x26   : > { %s1221_s16 = scalar_lea.hbm %s1565_s5, 1024 }
  0x27   : > { %p1222_p3 = scmp.ne.s32.totalorder %s1565_s5, %s1221_s16  ;;  %p1228_p8 = scmp.lt.u32.totalorder %s1221_s16, %s1565_s5 }
  0x29   : > { %p1224_p4 = pnand %p1222_p3, %p1195_p10 }
  0x2b   : > { %p1225_p6 = pneg %p1224_p4 }
  0x2d   : > { %p1230_p11 = pnand %p1228_p8, %p1225_p6 }
  0x2f   : > { %1233 = shalt.err (!%p1230_p11)
}
  0x30   : > { %s1234_s10 = scalar_lea.vmem %s260_s13, 1024  ;;  %p1242_p1 = scmp.lt.s32.totalorder %s260_s13, %s260_s13 }
  0x31   : > { %p1235_p12 = scmp.ne.s32.totalorder %s260_s13, %s1234_s10  ;;  %p1243_p2 = scmp.lt.s32.totalorder %s1234_s10, %s1234_s10 }
  0x33   : > { %p1237_p13 = pnand %p1235_p12, %p1195_p10  ;;  %p1244_p5 = por %p1243_p2, %p1242_p1 }
  0x35   : > { %p1238_p0 = pneg %p1237_p13 }
  0x37   : > { %p1245_p9 = pnand %p1244_p5, %p1238_p0 }
  0x39   : > { %1248 = shalt.err (!%p1245_p9)
}
  0x3a   : > { %1107 = dma.hbm_to_vmem [thread:$0]  (!%p1427_p7), %s1565_s5, 1024, %s260_s13, [#allocation11], %s1341_s22, %s1341_s22, %s1342_s23  }
  0x3b   : > { %p1574_p3 = scmp.lt.s32.totalorder %s1337_s26, 2  ;;  %p1575_p4 = scmp.eq.s32.totalorder %s1337_s26, 0 }
  0x3c   : > { %s1343_s14 = smov [#allocation7]   ;;  %s1249_s11 = scalar_lea.hbm %s1560_s0, 512 }
  0x3d   : > { %p1479_p6 = pnand %p1575_p4, %p1574_p3  ;;  %s290_s15 = sshll.u32 %s1343_s14, 4  ;;  %s291_s15 = int_to_ptr.vmem [resolvable:$true] %s290_s15 }
  0x3e   : > { %p1250_p10 = scmp.ne.s32.totalorder %s1560_s0, %s1249_s11  ;;  %p1256_p11 = scmp.lt.u32.totalorder %s1249_s11, %s1560_s0 }
  0x3f   : > { %p1251_p7 = pneg %p1479_p6 }
  0x41   : > { %p1252_p9 = pnand %p1251_p7, %p1250_p10 }
  0x43   : > { %p1253_p8 = pneg %p1252_p9 }
  0x45   : > { %p1258_p12 = pnand %p1256_p11, %p1253_p8 }
  0x47   : > { %1261 = shalt.err (!%p1258_p12)
}
  0x48   : > { %s1262_s23 = scalar_lea.vmem %s291_s15, 512  ;;  %s1269_s20 = scalar_lea.vmem %s291_s15, 1024 }
  0x49   : > { %p1263_p13 = scmp.ne.s32.totalorder %s291_s15, %s1262_s23  ;;  %p1270_p2 = scmp.lt.s32.totalorder %s291_s15, %s291_s15 }
  0x4a   : > { %p1271_p5 = scmp.lt.s32.totalorder %s1269_s20, %s1262_s23 }
  0x4b   : > { %p1265_p0 = pnand %p1263_p13, %p1251_p7 }
  0x4c   : > { %p1272_p3 = por %p1271_p5, %p1270_p2 }
  0x4d   : > { %p1266_p1 = pneg %p1265_p0 }
  0x4f   : > { %p1273_p4 = pnand %p1272_p3, %p1266_p1 }
  0x51   : > { %1276 = shalt.err (!%p1273_p4)
}
  0x52   : > { %s1344_s10 = smov 128   ;;  %s1345_s21 = smov 8  }
  0x53   : > { %1111 = dma.hbm_to_vmem [thread:$0]  (!%p1479_p6), %s1560_s0, 512, %s291_s15, [#allocation8], %s1344_s10, %s1344_s10, %s1345_s21  }
  0x54   : > { %p1577_p10 = scmp.ne.s32.totalorder %s1572_s8, 0 }
  0x55   : > { %p1578_p7 = scmp.ne.s32.totalorder (!%p1577_p10), %s1571_s30, 0 }
  0x56   : > { %302 = sbr.rel (%p1577_p10) target bundleno = 681 (0x2a9), region = 48 }
  0x5d   : > { %1316 = dma.done.wait (%p1578_p7), [#allocation8], 512  }
  0x5e   : > { %1318 = vsyncadd (%p1578_p7), [#allocation8], 4294966784 }
  0x5f   : > { %1320 = dma.done.wait (%p1578_p7), [#allocation11], 3072  }
  0x60   : > { %1322 = vsyncadd (%p1578_p7), [#allocation11], 4294964224  ;;  %p973_p9 = scmp.ne.s32.totalorder %s1329_s24, 0 }
  0x61   : > { %v1161_v0 = vld [vmem:[#allocation10 + $0x40] sm:$0xff] (!%p973_p9)   ;;  %v1163_v2 = vld [vmem:[#allocation10 + $0x48] sm:$0xff] (!%p973_p9)   ;;  %v1165_v4 = vld [vmem:[#allocation10 + $0x50] sm:$0xff] (!%p973_p9)   ;;  %v1346_v20 = vmov (!%p973_p9), 0.0  }
  0x62   : > { %357 = sbr.rel (%p973_p9) target bundleno = 405 (0x195), region = 64  ;;  %v1162_v1 = vld [vmem:[#allocation10] sm:$0xff] (!%p973_p9)   ;;  %1011 = vmatprep.subr.bf16.mxu0 (!%p973_p9), %v1161_v0  ;;  %1069 = vmatprep.subr.bf16.mxu1 (!%p973_p9), %v1161_v0  ;;  %v1164_v3 = vld [vmem:[#allocation10 + $0x8] sm:$0xff] (!%p973_p9)   ;;  %v1166_v5 = vld [vmem:[#allocation10 + $0x10] sm:$0xff] (!%p973_p9)   ;;  %582 = vst [vmem:[#allocation2] sm:$0x1] (!%p973_p9), %v1346_v20 }
  0x63   : > { %1012 = vmatpush3.bf16.msra.mxu0 (!%p973_p9), %v1162_v1  ;;  %1077 = vmatpush3.bf16.msra.mxu1 (!%p973_p9), %v1162_v1  ;;  %v1167_v6 = vld [vmem:[#allocation10 + $0x58] sm:$0xff] (!%p973_p9)   ;;  %v1169_v8 = vld [vmem:[#allocation10 + $0x60] sm:$0xff] (!%p973_p9)   ;;  %v1171_v10 = vld [vmem:[#allocation10 + $0x68] sm:$0xff] (!%p973_p9)   ;;  %583 = vst [vmem:[#allocation3] sm:$0x1] (!%p973_p9), %v1346_v20 }
  0x64   : > { %1013 = vmatprep.subr.bf16.mxu0 (!%p973_p9), %v1163_v2  ;;  %1070 = vmatprep.subr.bf16.mxu1 (!%p973_p9), %v1163_v2  ;;  %v1168_v7 = vld [vmem:[#allocation10 + $0x18] sm:$0xff] (!%p973_p9)   ;;  %v1170_v9 = vld [vmem:[#allocation10 + $0x20] sm:$0xff] (!%p973_p9)   ;;  %v1172_v13 = vld [vmem:[#allocation10 + $0x28] sm:$0xff] (!%p973_p9)  }
  0x65   : > { %v1179_v11 = vld [vmem:[#allocation7 + $0x4] ss:$8 sps:$4 sm:$0xff] (!%p973_p9)   ;;  %v1182_v12 = vld [vmem:[#allocation7 + $0x14] ss:$8 sps:$4 sm:$0xff] (!%p973_p9)   ;;  %v1177_v18 = vld [vmem:[#allocation7] ss:$8 sps:$4 sm:$0xff] (!%p973_p9)  }
  0x66   : > { %v1173_v14 = vld [vmem:[#allocation10 + $0x70] sm:$0xff] (!%p973_p9)   ;;  %549 = vmatprep.mubr.bf16.mxu0 (!%p973_p9), %v1179_v11  ;;  %557 = vmatprep.mubr.bf16.mxu1 (!%p973_p9), %v1182_v12  ;;  %v1175_v16 = vld [vmem:[#allocation10 + $0x78] sm:$0xff] (!%p973_p9)   ;;  %v974_v23 = vld [vmem:[%s1562_s2] ss:$0 sm:$0xff] (!%p973_p9) }
  0x67   : > { %1014 = vmatpush3.bf16.msra.mxu0 (!%p973_p9), %v1164_v3  ;;  %1078 = vmatpush3.bf16.msra.mxu1 (!%p973_p9), %v1164_v3  ;;  %v1174_v15 = vld [vmem:[#allocation10 + $0x30] sm:$0xff] (!%p973_p9)   ;;  %v1176_v17 = vld [vmem:[#allocation10 + $0x38] sm:$0xff] (!%p973_p9)   ;;  %v672_v11 = vld [vmem:[%s1563_s3] sm:$0x1] (!%p973_p9) }
  0x68   : > { %1015 = vmatprep.subr.bf16.mxu0 (!%p973_p9), %v1165_v4  ;;  %1071 = vmatprep.subr.bf16.mxu1 (!%p973_p9), %v1165_v4  ;;  %v1180_v19 = vld [vmem:[#allocation7 + $0x10] ss:$8 sps:$4 sm:$0xff] (!%p973_p9)  }
  0x69   : > { %v602_v60 = vld [vmem:[#allocation2] sm:$0x1] }
  0x6a   : > { %v614_v63 = vld [vmem:[#allocation3] sm:$0x1] }
  0x6b   : > { %1016 = vmatpush3.bf16.msra.mxu0 %v1166_v5  ;;  %1079 = vmatpush3.bf16.msra.mxu1 %v1166_v5 }
  0x6c   : > { %1017 = vmatprep.subr.bf16.mxu0 %v1167_v6  ;;  %1072 = vmatprep.subr.bf16.mxu1 %v1167_v6 }
  0x6f   : > { %1018 = vmatpush3.bf16.msra.mxu0 %v1168_v7  ;;  %1080 = vmatpush3.bf16.msra.mxu1 %v1168_v7 }
  0x70   : > { %1019 = vmatprep.subr.bf16.mxu0 %v1169_v8  ;;  %1073 = vmatprep.subr.bf16.mxu1 %v1169_v8 }
  0x73   : > { %1020 = vmatpush3.bf16.msra.mxu0 %v1170_v9  ;;  %1081 = vmatpush3.bf16.msra.mxu1 %v1170_v9 }
  0x74   : > { %1021 = vmatprep.subr.bf16.mxu0 %v1171_v10  ;;  %1074 = vmatprep.subr.bf16.mxu1 %v1171_v10 }
  0x77   : > { %1022 = vmatpush3.bf16.msra.mxu0 %v1172_v13  ;;  %1082 = vmatpush3.bf16.msra.mxu1 %v1172_v13 }
  0x78   : > { %1023 = vmatprep.subr.bf16.mxu0 %v1173_v14  ;;  %1075 = vmatprep.subr.bf16.mxu1 %v1173_v14  ;;  %v677_v14 = vld [vmem:[%s1564_s4] sm:$0x1] }
  0x7b   : > { %1024 = vmatpush3.bf16.msra.mxu0 %v1174_v15  ;;  %1083 = vmatpush3.bf16.msra.mxu1 %v1174_v15 }
  0x7c   : > { %1025 = vmatprep.subr.bf16.mxu0 %v1175_v16  ;;  %1076 = vmatprep.subr.bf16.mxu1 %v1175_v16 }
  0x7f   : > { %1026 = vmatpush3.bf16.msra.mxu0 %v1176_v17  ;;  %1084 = vmatpush3.bf16.msra.mxu1 %v1176_v17 }
  0x82   : > { %550 = vmatmul.mubr.bf16.vlgmr.msra.gmra.mrb[0].mxu0 %v1177_v18  ;;  %558 = vmatmul.mubr.bf16.vlgmr.msra.gmra.mrb[0].mxu1 %v1180_v19 }
 0x155   : > { %v1027_v21 = vpop.f32.mrb[0].mxu0  ;;  %v1033_v22 = vpop.f32.mrb[0].mxu1 }
 0x156   : > { %v1028_v24 = vpop.f32.mrb[1].mxu0  ;;  %v1034_v25 = vpop.f32.mrb[1].mxu1 }
 0x157   : > { %v1029_v26 = vadd.f32 %v1028_v24, %v1027_v21  ;;  %v1030_v27 = vpop.f32.mrb[2].mxu0  ;;  %v1035_v28 = vadd.f32 %v1034_v25, %v1033_v22  ;;  %v1036_v29 = vpop.f32.mrb[2].mxu1 }
 0x158   : > { %v1031_v30 = vpop.f32.mrb[3].mxu0  ;;  %v1037_v31 = vpop.f32.mrb[3].mxu1 }
 0x159   : > { %v552_v32 = vadd.f32 %v1029_v26, %v974_v23  ;;  %v560_v33 = vadd.f32 %v1035_v28, %v974_v23  ;;  %v1032_v34 = vadd.f32 %v1031_v30, %v1030_v27  ;;  %v1038_v35 = vadd.f32 %v1037_v31, %v1036_v29 }
 0x15b   : > { %v566_v36 = vmax.f32 %v552_v32, 0.0  ;;  %v568_v37 = vmax.f32 %v560_v33, 0.0  ;;  %v555_v38 = vadd.f32 %v1032_v34, %v974_v23  ;;  %v563_v39 = vadd.f32 %v1038_v35, %v974_v23 }
 0x15d   : > { %v567_v40 = vmax.f32 %v555_v38, 0.0  ;;  %v569_v41 = vmax.f32 %v563_v39, 0.0  ;;  %v615_v42 = vmul.f32 %v566_v36, %v566_v36  ;;  %v617_v43 = vmul.f32 %v568_v37, %v568_v37 }
 0x15f   : > { %v570_v44 = vpack.c.bf16 %v567_v40, %v566_v36  ;;  %v603_v45 = vadd.f32 %v567_v40, %v566_v36  ;;  %v616_v46 = vmul.f32 %v567_v40, %v567_v40  ;;  %v571_v47 = vpack.c.bf16 %v569_v41, %v568_v37 }
 0x161   : > { %576 = vst [vmem:[#allocation6] sm:$0xff] %v570_v44  ;;  %v604_v48 = vadd.f32 %v603_v45, %v568_v37  ;;  %v619_v49 = vadd.f32 %v616_v46, %v615_v42  ;;  %577 = vst [vmem:[#allocation6 + $0x8] sm:$0xff] %v571_v47 }
 0x163   : > { %v606_v50 = vrot.slane %v604_v48, 4  ;;  %v620_v51 = vadd.f32 %v619_v49, %v617_v43 }
 0x165   : > { %v607_v52 = vadd.f32 %v606_v50, %v604_v48  ;;  %v622_v53 = vrot.slane %v620_v51, 4 }
 0x167   : > { %v608_v54 = vrot.slane %v607_v52, 2  ;;  %v623_v55 = vadd.f32 %v622_v53, %v620_v51 }
 0x169   : > { %v609_v56 = vadd.f32 %v608_v54, %v607_v52  ;;  %v624_v57 = vrot.slane %v623_v55, 2 }
 0x16b   : > { %v610_v58 = vrot.slane %v609_v56, 1  ;;  %v625_v59 = vadd.f32 %v624_v57, %v623_v55 }
 0x16d   : > { %v611_v61 = vadd.f32 %v610_v58, %v609_v56  ;;  %v626_v62 = vrot.slane %v625_v59, 1 }
 0x16f   : > { %v612_v0 = vadd.f32 %v611_v61, %v602_v60  ;;  %v627_v1 = vadd.f32 %v626_v62, %v625_v59 }
 0x171   : > { %613 = vst [vmem:[#allocation2] sm:$0x1] %v612_v0  ;;  %v628_v2 = vadd.f32 %v627_v1, %v614_v63 }
 0x173   : > { %629 = vst [vmem:[#allocation3] sm:$0x1] %v628_v2 }
 0x178   : > { %v665_v3 = vld [vmem:[#allocation2] sm:$0x1] }
 0x179   : > { %v666_v4 = vmul.f32 0.041666668, %v665_v3 }
 0x17a   : > { %v667_v5 = vld [vmem:[#allocation3] sm:$0x1] }
 0x17b   : > { %v668_v6 = vmul.f32 0.041666668, %v667_v5  ;;  %v669_v7 = vmul.f32 %v666_v4, %v666_v4 }
 0x17d   : > { %v670_v8 = vsub.f32 %v668_v6, %v669_v7 }
 0x17f   : > { %v671_v9 = vmax.f32 %v670_v8, 0.0 }
 0x181   : > { %v673_v10 = vadd.f32 1e-05, %v671_v9 }
 0x183   : > { %1183 = vrsqrt.f32 %v673_v10 }
 0x18d   : > { %v1184_v12 = vpop.eup %1183 }
 0x18e   : > { %v675_v13 = vmul.f32 %v1184_v12, %v672_v11 }
 0x190   : > { %676 = vst [vmem:[#allocation4] sm:$0x1] %v675_v13  ;;  %v678_v15 = vmul.f32 %v675_v13, %v666_v4 }
 0x192   : > { %v679_v16 = vsub.f32 %v677_v14, %v678_v15 }
 0x194   : > { %680 = vst [vmem:[#allocation5] sm:$0x1] %v679_v16 }
 0x195 PF: > { %p995_p6 = scmp.ne.s32.totalorder %s1329_s24, 1 }
 0x196   : > { %v1185_v17 = vld [vmem:[#allocation12] sm:$0xff] (!%p995_p6)   ;;  %v1186_v18 = vld [vmem:[#allocation12 + $0x8] sm:$0xff] (!%p995_p6)   ;;  %v1187_v19 = vld [vmem:[#allocation12 + $0x10] sm:$0xff] (!%p995_p6)  }
 0x197   : > { %684 = sbr.rel (%p995_p6) target bundleno = 657 (0x291), region = 80  ;;  %1049 = vmatprep.subr.bf16.mxu0 (!%p995_p6), %v1185_v17  ;;  %v1188_v20 = vld [vmem:[#allocation12 + $0x18] sm:$0xff] (!%p995_p6)   ;;  %v689_v21 = vld [vmem:[#allocation6] sm:$0xff] (!%p995_p6)  ;;  %v996_v22 = vld [vmem:[#allocation4] ss:$0 sm:$0xff] (!%p995_p6) }
 0x198   : > { %1050 = vmatpush3.bf16.msra.mxu0 (!%p995_p6), %v1185_v17  ;;  %v691_v23 = vunpack.c.l.bf16 (!%p995_p6), %v689_v21  ;;  %v692_v24 = vunpack.c.h.bf16 (!%p995_p6), %v689_v21  ;;  %v1189_v28 = vld [vmem:[#allocation12 + $0x20] sm:$0xff] (!%p995_p6)   ;;  %v690_v32 = vld [vmem:[#allocation6 + $0x8] sm:$0xff] (!%p995_p6)  ;;  %v1190_v33 = vld [vmem:[#allocation12 + $0x28] sm:$0xff] (!%p995_p6)  }
 0x199   : > { %1051 = vmatprep.subr.bf16.mxu0 (!%p995_p6), %v1186_v18  ;;  %v693_v34 = vunpack.c.l.bf16 (!%p995_p6), %v690_v32  ;;  %v694_v35 = vunpack.c.h.bf16 (!%p995_p6), %v690_v32  ;;  %v1191_v36 = vld [vmem:[#allocation12 + $0x30] sm:$0xff] (!%p995_p6)   ;;  %v1192_v39 = vld [vmem:[#allocation12 + $0x38] sm:$0xff] (!%p995_p6)   ;;  %v998_v43 = vld [vmem:[%s1566_s6] ss:$0 sm:$0xff] (!%p995_p6) }
 0x19a   : > { %v702_v26 = vmul.f32 (!%p995_p6), %v996_v22, %v691_v23  ;;  %v703_v27 = vmul.f32 (!%p995_p6), %v996_v22, %v692_v24 }
 0x19b   : > { %v997_v25 = vld [vmem:[#allocation5] ss:$0 sm:$0xff] (!%p995_p6)  ;;  %v704_v37 = vmul.f32 (!%p995_p6), %v996_v22, %v693_v34  ;;  %v705_v38 = vmul.f32 (!%p995_p6), %v996_v22, %v694_v35 }
 0x19c   : > { %1052 = vmatpush3.bf16.msra.mxu0 (!%p995_p6), %v1186_v18  ;;  %v713_v29 = vadd.f32 (!%p995_p6), %v997_v25, %v702_v26  ;;  %v714_v30 = vadd.f32 (!%p995_p6), %v997_v25, %v703_v27 }
 0x19d   : > { %1053 = vmatprep.subr.bf16.mxu0 (!%p995_p6), %v1187_v19  ;;  %v715_v40 = vadd.f32 (!%p995_p6), %v997_v25, %v704_v37  ;;  %v716_v41 = vadd.f32 (!%p995_p6), %v997_v25, %v705_v38 }
 0x19e   : > { %v717_v31 = vpack.c.bf16 %v714_v30, %v713_v29 }
 0x19f   : > { %v718_v42 = vpack.c.bf16 %v716_v41, %v715_v40 }
 0x1a0   : > { %1054 = vmatpush3.bf16.msra.mxu0 %v1187_v19  ;;  %1065 = vmatprep.mubr.bf16.mxu0 %v717_v31 }
 0x1a1   : > { %1055 = vmatprep.subr.bf16.mxu0 %v1188_v20 }
 0x1a4   : > { %1056 = vmatpush3.bf16.msra.mxu0 %v1188_v20 }
 0x1a5   : > { %1057 = vmatprep.subr.bf16.mxu0 %v1189_v28 }
 0x1a8   : > { %1058 = vmatpush3.bf16.msra.mxu0 %v1189_v28 }
 0x1a9   : > { %1059 = vmatprep.subr.bf16.mxu0 %v1190_v33 }
 0x1ac   : > { %1060 = vmatpush3.bf16.msra.mxu0 %v1190_v33 }
 0x1ad   : > { %1061 = vmatprep.subr.bf16.mxu0 %v1191_v36 }
 0x1b0   : > { %1062 = vmatpush3.bf16.msra.mxu0 %v1191_v36 }
 0x1b1   : > { %1063 = vmatprep.subr.bf16.mxu0 %v1192_v39 }
 0x1b4   : > { %1064 = vmatpush3.bf16.msra.mxu0 %v1192_v39 }
 0x1b7   : > { %1066 = vmatmul.mubr.bf16.vlgmr.msra.gmra.mrb[0].mxu0 %v718_v42 }
 0x28a   : > { %v1067_v44 = vpop.f32.mrb[0].mxu0 }
 0x28b   : > { %v833_v45 = vadd.f32 %v1067_v44, %v998_v43  ;;  %v824_v46 = vpop.f32.mrb[1].mxu0 }
 0x28c   : > { %v825_v47 = vadd.f32 %v998_v43, %v824_v46  ;;  %v1068_v48 = vpop.f32.mrb[2].mxu0 }
 0x28d   : > { %841 = vst [vmem:[#allocation13 + $0x10] sm:$0xff] %v833_v45  ;;  %v836_v49 = vadd.f32 %v1068_v48, %v998_v43  ;;  %v827_v50 = vpop.f32.mrb[3].mxu0 }
 0x28e   : > { %839 = vst [vmem:[#allocation13] sm:$0xff] %v825_v47  ;;  %v828_v51 = vadd.f32 %v998_v43, %v827_v50 }
 0x28f   : > { %842 = vst [vmem:[#allocation13 + $0x18] sm:$0xff] %v836_v49 }
 0x290   : > { %840 = vst [vmem:[#allocation13 + $0x8] sm:$0xff] %v828_v51 }
 0x291 PF: > { %p1525_p8 = scmp.eq.s32.totalorder %s962_s27, 1  ;;  %s1347_s19 = smov [#allocation13]  }
 0x292   : > { %s858_s13 = sshll.u32 %s1347_s19, 4  ;;  %s859_s13 = int_to_ptr.vmem [resolvable:$true] %s858_s13 }
 0x293   : > { %s1277_s22 = scalar_lea.vmem %s859_s13, 512  ;;  %s1283_s23 = scalar_lea.vmem %s859_s13, 1024 }
 0x294   : > { %p1278_p11 = scmp.ne.s32.totalorder %s859_s13, %s1277_s22  ;;  %p1284_p0 = scmp.lt.s32.totalorder %s859_s13, %s859_s13 }
 0x295   : > { %p1285_p1 = scmp.lt.s32.totalorder %s1283_s23, %s1277_s22 }
 0x296   : > { %p1279_p12 = pnand %p1278_p11, %p1525_p8 }
 0x297   : > { %p1286_p2 = por %p1285_p1, %p1284_p0 }
 0x298   : > { %p1280_p13 = pneg %p1279_p12 }
 0x29a   : > { %p1287_p5 = pnand %p1286_p2, %p1280_p13 }
 0x29c   : > { %1290 = shalt.err (!%p1287_p5)
}
 0x29d   : > { %s1291_s10 = scalar_lea.hbm %s1567_s7, 512 }
 0x29e   : > { %p1292_p3 = scmp.ne.s32.totalorder %s1567_s7, %s1291_s10  ;;  %p1297_p7 = scmp.lt.u32.totalorder %s1291_s10, %s1567_s7 }
 0x2a0   : > { %p1293_p4 = pnand %p1292_p3, %p1525_p8 }
 0x2a2   : > { %p1294_p10 = pneg %p1293_p4 }
 0x2a4   : > { %p1299_p9 = pnand %p1297_p7, %p1294_p10 }
 0x2a6   : > { %1302 = shalt.err (!%p1299_p9)
}
 0x2a7   : > { %s1348_s8 = smov 128   ;;  %s1349_s12 = smov 8  }
 0x2a8   : > { %1098 = dma.vmem_to_hbm [thread:$0]  (%p1525_p8), %s859_s13, 512, %s1567_s7, [#allocation9], %s1348_s8, %s1348_s8, %s1349_s12  }
 0x2a9 PF: > { %p1125_p6 = scmp.eq.s32.totalorder %s963_s28, 1  ;;  %p1580_p11 = scmp.ge.s32.totalorder %s1337_s26, 2 }
 0x2ab   : > { %p1113_p12 = pnand %p1125_p6, %p1580_p11 }
 0x2ad   : > { %1324 = dma.done.wait (!%p1113_p12), [#allocation9], 512  }
 0x2ae   : > { %1326 = vsyncadd (!%p1113_p12), [#allocation9], 4294966784  ;;  %s24_s26 = sadd.s32 1, %s1337_s26   ;;  %s1581_s24 = smov %s1333_s25 }
 0x2af   : > { %p21_p13 = scmp.ge.s32.totalorder %s24_s26, 4   ;;  %s1582_s25 = smov %s1584_s29 }
 0x2b1   :  { %23 = sbr.rel (!%p21_p13) target bundleno = 6 (0x6), region = 123 }
 0x2b8   :  { %879 = vsyncpa [#allocation8], 1 }
 0x2b9   :  { %881 = vsyncpa [#allocation8 + $0x1], 1 }
 0x2ba   :  { %882 = vsyncpa [#allocation11], 1 }
 0x2bb   :  { %883 = vsyncpa [#allocation9], 1 }
 0x2bc   :  { %885 = vsyncpa [#allocation9 + $0x1], 1 }

</bundles_post_ra>
